<compile_context>
chip_gen: v5e
topology: v5e:2x2
jax: 0.10.0
libtpu: 0.0.40
codegen_flags: <defaults>
</compile_context>

<pallas_src>
import functools

import jax
import jax.numpy as jnp
from jax.experimental import pallas as pl
from jax.experimental.pallas import tpu as pltpu


def _kl_div_kernel(s_ref, t_ref, o_ref, *, inv_temperature, n_valid, tile_n,
                   mask_rows):
    # Upcast to f32 for compute (inputs may be bf16 in HBM to halve traffic).
    s = s_ref[...].astype(jnp.float32)
    t = t_ref[...].astype(jnp.float32)
    if inv_temperature != 1.0:          # static: skip two full-tile muls at T == 1
        s = s * inv_temperature          # multiply, not divide
        t = t * inv_temperature

    # log_softmax(student) pieces over the class (lane) axis.
    s_max = jnp.max(s, axis=-1, keepdims=True)
    s_shift = s - s_max
    s_lse = jnp.log(jnp.sum(jnp.exp(s_shift), axis=-1, keepdims=True))

    # Teacher softmax pieces, divide-free (factor 1/t_sum out of the reduction).
    t_max = jnp.max(t, axis=-1, keepdims=True)
    t_shift = t - t_max
    t_exp = jnp.exp(t_shift)
    t_sum = jnp.sum(t_exp, axis=-1, keepdims=True)

    # KL row term: sum_c p_c * (log p_c - log q_c)
    #   = (1/t_sum) * sum_c t_exp_c * ((t_shift_c - s_shift_c) + (s_lse - log t_sum))
    # Per-row scalars combined *before* broadcasting (one fewer full-tile op);
    # t_exp underflow to 0 contributes exactly 0, so no where() mask is needed.
    row_bias = s_lse - jnp.log(t_sum)                               # (tile_n, 1)
    row_partial = jnp.sum(t_exp * ((t_shift - s_shift) + row_bias),
                          axis=-1, keepdims=True)
    # One exact reciprocal per row (keeps the 1e-5 tolerance; approx would not).
    row_kl = row_partial * pl.reciprocal(t_sum, approx=False)

    if mask_rows:
        # Ragged last tile: rows past n_valid hold undefined HBM data (possibly
        # NaN/Inf) -> force their contribution to exactly 0 before the store.
        row_idx = (pl.program_id(0) * tile_n
                   + jax.lax.broadcasted_iota(jnp.int32, row_kl.shape, 0))
        row_kl = jnp.where(row_idx < n_valid, row_kl, 0.0)
    # TODO(synk): for C <= a few hundred a lane-dense / per-tile-reduced output
    # layout would relieve the masked-vst pressure of this (tile_n, 1) store.
    o_ref[...] = row_kl


def _tpu_vmem_bytes() -> int:
    try:
        return int(pltpu.get_tpu_info().vmem_capacity_bytes)
    except Exception:
        return 64 * 1024 * 1024          # conservative fallback (v7x-sized VMEM)


def _choose_tiling(n, c, itemsize):
    """Pick (tile_n, num_tiles, vmem_limit_bytes), TPU-generation aware."""
    vmem = _tpu_vmem_bytes()
    if vmem >= 100 * 1024 * 1024:        # v5e / v6e: 128 MiB VMEM, single TensorCore
        buffer_budget = 32 * 1024 * 1024
        vmem_limit = 100 * 1024 * 1024
        two_cores = False
    else:                                 # v7x: 64 MiB VMEM, 2 TensorCores
        buffer_budget = 12 * 1024 * 1024
        vmem_limit = 56 * 1024 * 1024
        two_cores = True

    # Rows bounded by (a) 2 inputs x 2 pipeline buffers of (tile_n, C) and
    # (b) ~6 full-tile f32 elementwise temporaries Mosaic materializes.
    rows_buf = buffer_budget // max(1, 2 * 2 * c * itemsize)
    rows_tmp = (vmem_limit - buffer_budget) // max(1, 6 * c * 4)
    max_rows = min(rows_buf, rows_tmp, 8192)
    # TODO(synk): for vocab-scale C (>~64k classes) even 8 rows can exceed the
    # v7x budget; that needs a C-tiled online-softmax variant (running max/sum
    # per row + streamed accumulation of the cross term).
    max_rows = max(8, (max_rows // 8) * 8)

    if n <= max_rows and not (two_cores and n >= 16):
        # Single full block (full-dim exemption covers N % 8 != 0).
        return n, 1, vmem_limit

    tile = min(max_rows, n)
    if two_cores:
        # Keep >= 2 row tiles so both TensorCores get work on the parallel axis.
        half = ((-(-n // 2)) + 7) // 8 * 8
        tile = min(tile, half)
    tile = max(8, (tile // 8) * 8)
    num_tiles = -(-n // tile)
    if two_cores and num_tiles > 1 and num_tiles % 2 == 1:
        # Prefer an even tile count (balanced across the 2 TCs) when cheap.
        cand = max(8, ((-(-n // (num_tiles + 1))) + 7) // 8 * 8)
        cand_tiles = -(-n // cand)
        if cand_tiles % 2 == 0:
            tile, num_tiles = cand, cand_tiles
    return tile, num_tiles, vmem_limit


def kl_div_loss(s_logits, t_logits, temperature: float = 1.0, *,
                cast_to_bf16: bool = False, tile_n=None):
    assert s_logits.shape == t_logits.shape and s_logits.ndim == 2
    n, c = s_logits.shape

    if cast_to_bf16:
        # Pure HBM-bandwidth kernel (no matmul): halving input bytes ~doubles
        # throughput on v5e/v6e and shrinks pipeline buffers; compute stays f32.
        s_logits = s_logits.astype(jnp.bfloat16)
        t_logits = t_logits.astype(jnp.bfloat16)

    itemsize = s_logits.dtype.itemsize
    auto_tile, auto_tiles, vmem_limit = _choose_tiling(n, c, itemsize)
    if tile_n is None:
        tile_rows, num_tiles = auto_tile, auto_tiles
    else:
        tile_rows = min(int(tile_n), n)
        if tile_rows < n:
            tile_rows = max(8, (tile_rows // 8) * 8)
        num_tiles = -(-n // tile_rows)

    n_pad = num_tiles * tile_rows         # output-only padding; inputs are NOT copied
    inv_temperature = 1.0 / float(temperature)
    # nn.KLDivLoss default reduction='mean' divides by the total element count;
    # the module then multiplies by T^2 -> fold both into one host-side scale.
    scale = (temperature ** 2) / float(n * c)

    kernel = functools.partial(
        _kl_div_kernel,
        inv_temperature=inv_temperature,
        n_valid=n,
        tile_n=tile_rows,
        mask_rows=(n_pad != n),
    )

    # Per-row KL partials come out of the kernel; the tiny cross-tile reduction
    # and scaling happen outside so the grid axis stays fully "parallel"
    # (lets Mosaic shard row tiles across v7x's two TensorCores).
    per_row = pl.pallas_call(
        kernel,
        out_shape=jax.ShapeDtypeStruct((n_pad, 1), jnp.float32),
        grid_spec=pltpu.PrefetchScalarGridSpec(
            num_scalar_prefetch=0,
            grid=(num_tiles,),
            in_specs=[
                pl.BlockSpec((tile_rows, c), lambda i: (i, 0)),
                pl.BlockSpec((tile_rows, c), lambda i: (i, 0)),
            ],
            out_specs=pl.BlockSpec((tile_rows, 1), lambda i: (i, 0)),
        ),
        compiler_params=pltpu.CompilerParams(
            dimension_semantics=("parallel",),
            vmem_limit_bytes=vmem_limit,
        ),
    )(s_logits, t_logits)

    # Masked (padded) rows are exact zeros, so sum the whole padded output.
    return jnp.sum(per_row) * scale


if __name__ == "__main__":
    def reference(s_logits, t_logits, temperature):
        s = s_logits.astype(jnp.float32) / temperature
        t = t_logits.astype(jnp.float32) / temperature
        s_logp = jax.nn.log_softmax(s, axis=1)
        t_p = jax.nn.softmax(t, axis=1)
        t_logp = jax.nn.log_softmax(t, axis=1)
        return (jnp.mean(jnp.where(t_p > 0, t_p * (t_logp - s_logp), 0.0))
                * temperature ** 2)

    key = jax.random.PRNGKey(0)
    k1, k2 = jax.random.split(key)

    # Case 1: small f32, batch=8, classes=32, T=2 (original shapes).
    N, C = 8, 32
    s32 = jax.random.normal(k1, (N, C), dtype=jnp.float32)
    t32 = jax.random.normal(k2, (N, C), dtype=jnp.float32)
    loss = kl_div_loss(s32, t32, temperature=2.0)
    jax.block_until_ready(loss)
    ref = reference(s32, t32, 2.0)
    assert jnp.allclose(loss, ref, rtol=1e-5, atol=1e-6), (loss, ref)

    # Case 2: ragged N with a forced multi-tile grid -> exercises the in-kernel
    # row masking that replaced the host-side jnp.pad.
    N2, C2 = 20, 160
    s2 = jax.random.normal(jax.random.PRNGKey(1), (N2, C2), dtype=jnp.float32)
    t2 = jax.random.normal(jax.random.PRNGKey(2), (N2, C2), dtype=jnp.float32)
    loss2 = kl_div_loss(s2, t2, temperature=1.0, tile_n=8)
    jax.block_until_ready(loss2)
    ref2 = reference(s2, t2, 1.0)
    assert jnp.allclose(loss2, ref2, rtol=1e-5, atol=1e-6), (loss2, ref2)

    # Case 3: bf16-input path (HBM-traffic halving); reference sees the same
    # bf16 inputs so the f32 in-kernel compute should match tightly.
    loss3 = kl_div_loss(s2, t2, temperature=2.0, cast_to_bf16=True)
    jax.block_until_ready(loss3)
    ref3 = reference(s2.astype(jnp.bfloat16), t2.astype(jnp.bfloat16), 2.0)
    assert jnp.allclose(loss3, ref3, rtol=1e-4, atol=1e-5), (loss3, ref3)

    print("KERNEL_OK")
</pallas_src>

<mosaic_0001>
module attributes {stable_mosaic.version = 11 : i64} {
  func.func @_kl_div_kernel(%arg0: i32, %arg1: memref<8x32xf32, #tpu.memory_space<vmem>>, %arg2: memref<8x32xf32, #tpu.memory_space<vmem>>, %arg3: memref<8x1xf32, #tpu.memory_space<vmem>>) attributes {dimension_semantics = [#tpu.dimension_semantics<parallel>], iteration_bounds = array<i64: 1>, scalar_prefetch = 0 : i64, scratch_operands = 0 : i64, tpu.core_type = #tpu.core_type<tc>, window_params = [{transform_indices = @transform_0, window_bounds = array<i64: 8, 32>}, {transform_indices = @transform_1, window_bounds = array<i64: 8, 32>}, {transform_indices = @transform_2, window_bounds = array<i64: 8, 1>}]} {
    %c0 = arith.constant 0 : index
    %c0_0 = arith.constant 0 : index
    %0 = vector.load %arg1[%c0, %c0_0] : memref<8x32xf32, #tpu.memory_space<vmem>>, vector<8x32xf32>
    %c0_1 = arith.constant 0 : index
    %c0_2 = arith.constant 0 : index
    %1 = vector.load %arg2[%c0_1, %c0_2] : memref<8x32xf32, #tpu.memory_space<vmem>>, vector<8x32xf32>
    %cst = arith.constant 5.000000e-01 : f32
    %2 = vector.broadcast %cst : f32 to vector<8x32xf32>
    %3 = arith.mulf %0, %2 : vector<8x32xf32>
    %cst_3 = arith.constant 5.000000e-01 : f32
    %4 = vector.broadcast %cst_3 : f32 to vector<8x32xf32>
    %5 = arith.mulf %1, %4 : vector<8x32xf32>
    %cst_4 = arith.constant dense<0xFF800000> : vector<8xf32>
    %6 = vector.multi_reduction <maximumf>, %3, %cst_4 [1] : vector<8x32xf32> to vector<8xf32>
    %7 = vector.shape_cast %6 : vector<8xf32> to vector<8x1xf32>
    %8 = vector.broadcast %7 : vector<8x1xf32> to vector<8x32xf32>
    %9 = arith.subf %3, %8 : vector<8x32xf32>
    %10 = math.exp %9 : vector<8x32xf32>
    %cst_5 = arith.constant dense<0.000000e+00> : vector<8xf32>
    %11 = vector.multi_reduction <add>, %10, %cst_5 [1] : vector<8x32xf32> to vector<8xf32>
    %12 = vector.shape_cast %11 : vector<8xf32> to vector<8x1xf32>
    %13 = math.log %12 : vector<8x1xf32>
    %cst_6 = arith.constant dense<0xFF800000> : vector<8xf32>
    %14 = vector.multi_reduction <maximumf>, %5, %cst_6 [1] : vector<8x32xf32> to vector<8xf32>
    %15 = vector.shape_cast %14 : vector<8xf32> to vector<8x1xf32>
    %16 = vector.broadcast %15 : vector<8x1xf32> to vector<8x32xf32>
    %17 = arith.subf %5, %16 : vector<8x32xf32>
    %18 = math.exp %17 : vector<8x32xf32>
    %cst_7 = arith.constant dense<0.000000e+00> : vector<8xf32>
    %19 = vector.multi_reduction <add>, %18, %cst_7 [1] : vector<8x32xf32> to vector<8xf32>
    %20 = vector.shape_cast %19 : vector<8xf32> to vector<8x1xf32>
    %21 = math.log %20 : vector<8x1xf32>
    %22 = arith.subf %13, %21 : vector<8x1xf32>
    %23 = arith.subf %17, %9 : vector<8x32xf32>
    %24 = vector.broadcast %22 : vector<8x1xf32> to vector<8x32xf32>
    %25 = arith.addf %23, %24 : vector<8x32xf32>
    %26 = arith.mulf %18, %25 : vector<8x32xf32>
    %cst_8 = arith.constant dense<0.000000e+00> : vector<8xf32>
    %27 = vector.multi_reduction <add>, %26, %cst_8 [1] : vector<8x32xf32> to vector<8xf32>
    %28 = vector.shape_cast %27 : vector<8xf32> to vector<8x1xf32>
    %29 = tpu.reciprocal %20 : vector<8x1xf32> -> vector<8x1xf32>
    %30 = arith.mulf %28, %29 : vector<8x1xf32>
    %c0_9 = arith.constant 0 : index
    %c0_10 = arith.constant 0 : index
    %31 = vector.load %arg3[%c0_9, %c0_10] : memref<8x1xf32, #tpu.memory_space<vmem>>, vector<8x1xf32>
    tpu.vector_store %arg3[%c0_9, %c0_10], %30 {strides = array<i32>} : memref<8x1xf32, #tpu.memory_space<vmem>>, vector<8x1xf32>,
    return
  }
  func.func @transform_0(%arg0: i32) -> (i32, i32) {
    %c0_i32 = arith.constant 0 : i32
    %c0_i32_0 = arith.constant 0 : i32
    return %arg0, %c0_i32 : i32, i32
  }
  func.func @transform_1(%arg0: i32) -> (i32, i32) {
    %c0_i32 = arith.constant 0 : i32
    %c0_i32_0 = arith.constant 0 : i32
    return %arg0, %c0_i32 : i32, i32
  }
  func.func @transform_2(%arg0: i32) -> (i32, i32) {
    %c0_i32 = arith.constant 0 : i32
    %c0_i32_0 = arith.constant 0 : i32
    return %arg0, %c0_i32 : i32, i32
  }
}

</mosaic_0001>

<bundles_post_ra>
// kernel: tpu_custom_call.1
= control target key start
LH: loop header
LB: loop body
LE: loop exit
PB: predicated region body
PF: predicated region fallthrough
CT: control target
= control target key end

     0   :  { %7 = vsyncpa [#allocation3], 0  ;;  %s191_s0 = inlined_call_operand.hbm [shape: f32[8,32], index: 0, kind: input, shape index: {}]   ;;  %s192_s1 = inlined_call_operand.hbm [shape: f32[8,32], index: 1, kind: input, shape index: {}]   ;;  %s193_s2 = inlined_call_operand.vmem [shape: f32[8,1], index: 2, kind: output, shape index: {}]  }
   0x1   :  { %s14_s11 = sshll.u32 %s191_s0, 4  ;;  %s15_s11 = int_to_ptr.hbm [resolvable:$true] %s14_s11 }
   0x2   :  { %8 = vsyncpa [#allocation5], 0  ;;  %s160_s12 = smov [#allocation2]   ;;  %s25_s16 = sshll.u32 %s192_s1, 4  ;;  %s26_s16 = int_to_ptr.hbm [resolvable:$true] %s25_s16 }
   0x3   :  { %s16_s13 = sshll.u32 %s160_s12, 4  ;;  %s161_s17 = smov [#allocation4]   ;;  %s17_s13 = int_to_ptr.vmem [resolvable:$true] %s16_s13 }
   0x4   :  { %19 = dma.hbm_to_vmem [thread:$0]  %s15_s11, 128, %s17_s13, [#allocation3]  }
   0x5   :  { %s27_s18 = sshll.u32 %s161_s17, 4  ;;  %s28_s18 = int_to_ptr.vmem [resolvable:$true] %s27_s18 }
   0x6   :  { %30 = dma.hbm_to_vmem [thread:$0]  %s26_s16, 128, %s28_s18, [#allocation5]  }
   0x7   :  { %156 = dma.done.wait [#allocation3], 128  }
   0x8   :  { %157 = vsyncadd [#allocation3], 4294967168 }
   0x9   :  { %158 = dma.done.wait [#allocation5], 128  }
   0xa   :  { %159 = vsyncadd [#allocation5], 4294967168  ;;  %v39_v0 = vld [vmem:[#allocation2] sm:$0xff]  ;;  %vm43_vm0 = vcmask 261120   ;;  %v40_v2 = vld [vmem:[#allocation4] sm:$0xff]  ;;  %vm88_vm5 = vcmask 7168  }
   0xb   :  { %v41_v1 = vmul.f32 0.5, %v39_v0  ;;  %v42_v4 = vmul.f32 0.5, %v40_v2 }
   0xd   :  { %v44_v3 = vsel %vm43_vm0, %v41_v1, -inf  ;;  %v55_v5 = vsel %vm43_vm0, %v42_v4, -inf }
   0xe   :  { %45 = vmax.xlane.f32.xlu0 %v44_v3 }
  0x16   :  { %56 = vmax.xlane.f32.xlu0 %v55_v5 }
  0x81   :  { %v46_v6 = vpop.xlane.xlu0 %45 }
  0x82   :  { %v47_v7 = vsub.f32 %v41_v1, %v46_v6 }
  0x84   :  { %v48_v8 = vmul.f32 1.442695, %v47_v7 }
  0x86   :  { %98 = vpow2.f32 %v48_v8 }
  0x89   :  { %v57_v9 = vpop.xlane.xlu0 %56 }
  0x8a   :  { %v58_v10 = vsub.f32 %v42_v4, %v57_v9 }
  0x8c   :  { %v99_v11 = vpop.eup %98  ;;  %v59_v12 = vmul.f32 1.442695, %v58_v10  ;;  %v67_v13 = vsub.f32 %v58_v10, %v47_v7 }
  0x8d   :  { %v50_v14 = vsel %vm43_vm0, %v99_v11, 0.0 }
  0x8e   :  { %100 = vpow2.f32 %v59_v12  ;;  %51 = vadd.xlane.f32.xlu1 %v50_v14 }
  0x94   :  { %v101_v15 = vpop.eup %100 }
  0x95   :  { %v61_v16 = vsel %vm43_vm0, %v101_v15, 0.0 }
  0x96   :  { %62 = vadd.xlane.f32.xlu1 %v61_v16 }
 0x101   :  { %v52_v17 = vpop.xlane.xlu1 %51 }
 0x102   :  { %102 = vlog2.f32 %v52_v17 }
 0x108   :  { %v103_v19 = vpop.eup %102 }
 0x109   :  { %v63_v18 = vpop.xlane.xlu1 %62  ;;  %v54_v21 = vmul.f32 0.6931472, %v103_v19 }
 0x10a   :  { %104 = vlog2.f32 %v63_v18  ;;  %v84_v32 = vand.u32 2147483648, %v63_v18  ;;  %vm78_vm2 = vweird.f32 %v63_v18  ;;  %v82_v33 = vand.u32 2147483647, %v63_v18 }
 0x10b   :  { %106 = vrcp.f32 %v63_v18 }
 0x10c   :  { %v85_v35 = vor.u32 1.1754944e-38, %v84_v32  ;;  %vm83_vm4 = vcmp.eq.f32.partialorder %v82_v33, 8.507059e+37 }
 0x110   :  { %v105_v20 = vpop.eup %104 }
 0x111   :  { %v65_v22 = vmul.f32 0.6931472, %v105_v20  ;;  %v107_v27 = vpop.eup %106 }
 0x112   :  { %v74_v28 = vmul.f32 %v107_v27, %v63_v18  ;;  %vm79_vm1 = vweird.f32 %v107_v27 }
 0x113   :  { %v66_v23 = vsub.f32 %v54_v21, %v65_v22  ;;  %vm80_vm3 = vmor %vm78_vm2, %vm79_vm1 }
 0x114   :  { %v75_v29 = vsub.f32 1.0, %v74_v28 }
 0x115   :  { %v68_v24 = vadd.f32 %v67_v13, %v66_v23 }
 0x116   :  { %v76_v30 = vmul.f32 %v107_v27, %v75_v29 }
 0x117   :  { %v69_v25 = vmul.f32 %v101_v15, %v68_v24 }
 0x118   :  { %v77_v31 = vadd.f32 %v107_v27, %v76_v30 }
 0x119   :  { %v70_v26 = vsel %vm43_vm0, %v69_v25, 0.0 }
 0x11a   :  { %71 = vadd.xlane.f32.xlu2 %v70_v26  ;;  %v81_v34 = vsel %vm80_vm3, %v107_v27, %v77_v31 }
 0x11b   :  { %v86_v36 = vsel %vm83_vm4, %v85_v35, %v81_v34 }
 0x18d   :  { %v72_v37 = vpop.xlane.xlu2 %71 }
 0x18e   :  { %v87_v38 = vmul.f32 %v86_v36, %v72_v37 }
 0x190   :  { %89 = vst.msk [vmem:[%s193_s2] sm:$0xff] %vm88_vm5, %v87_v38 }
 0x191   :  { %94 = vsyncpa [#allocation3], 1 }
 0x192   :  { %95 = vsyncpa [#allocation5], 1 }

</bundles_post_ra>
